<compile_context>
chip_gen: v5e
topology: v5e:2x2
jax: 0.10.0
libtpu: 0.0.40
codegen_flags: <defaults>
</compile_context>

<pallas_src>
import functools

import jax
import jax.numpy as jnp
from jax.experimental import pallas as pl
from jax.experimental.pallas import tpu as pltpu

TINY = 1e-08


def _unit_norm_kernel(x_ref, o_ref, *, eps):
    # Squared sums in f32 for accuracy (also avoids bf16 overflow when squaring).
    x = x_ref[...].astype(jnp.float32)
    sq_sum = jnp.sum(x * x, axis=-1, keepdims=True)
    # clamp(norm, min=eps) then divide  ==  multiply by min(rsqrt(sq), 1/eps)
    # (rsqrt(0) = inf is clamped to 1/eps, matching x / eps for zero rows).
    inv = jnp.minimum(jax.lax.rsqrt(sq_sum), 1.0 / eps)
    o_ref[...] = (x * inv).astype(o_ref.dtype)


def _round_up(n, m):
    return ((n + m - 1) // m) * m


def _pick_block_rows(rows, hidden, itemsize, target_block_bytes=2 * 1024 * 1024):
    """Row tile sized for ~2 MiB of input per block, dtype-aware sublane packing."""
    row_multiple = {4: 8, 2: 16, 1: 32}.get(itemsize, 8)
    br = target_block_bytes // max(1, hidden * itemsize)
    br = max(row_multiple, (br // row_multiple) * row_multiple)
    # No point making the block (much) larger than the whole row extent.
    br = min(br, _round_up(rows, row_multiple))
    return br


def normalize_func(x, mode="none", eps=TINY, *, block_rows=None):
    """JAX/Pallas equivalent of NormalizeFunc.forward."""
    if mode == "none":
        return x
    assert mode == "unit", f"unsupported mode: {mode}"

    orig_shape = x.shape
    hidden = orig_shape[-1]
    rows = 1
    for d in orig_shape[:-1]:
        rows *= d
    x2d = x.reshape(rows, hidden)

    itemsize = jnp.dtype(x.dtype).itemsize
    if block_rows is None:
        block_rows = _pick_block_rows(rows, hidden, itemsize)

    grid = (pl.cdiv(rows, block_rows),)

    # VMEM budget: in + out, double-buffered, plus f32 compute temporaries.
    # Keep it comfortably under v7x's 64 MiB physical VMEM.
    block_bytes = block_rows * hidden * itemsize
    vmem_limit = min(64 * 1024 * 1024, max(16 * 1024 * 1024, 10 * block_bytes))

    # TODO(synk): for small hidden (< 128 lanes, e.g. 32) a lane-dense repack
    # (rows, hidden) -> (rows/g, g*hidden) with a segmented row-sum would avoid
    # masked partial stores; not worth it for the tiny shapes this module sees.
    out2d = pl.pallas_call(
        functools.partial(_unit_norm_kernel, eps=eps),
        out_shape=jax.ShapeDtypeStruct((rows, hidden), x.dtype),
        grid_spec=pltpu.PrefetchScalarGridSpec(
            num_scalar_prefetch=0,
            grid=grid,
            in_specs=[pl.BlockSpec((block_rows, hidden), lambda i: (i, 0))],
            out_specs=pl.BlockSpec((block_rows, hidden), lambda i: (i, 0)),
        ),
        compiler_params=pltpu.CompilerParams(
            dimension_semantics=("parallel",),
            vmem_limit_bytes=vmem_limit,
        ),
    )(x2d)

    return out2d.reshape(orig_shape)


def _reference(x, eps=TINY):
    x32 = x.astype(jnp.float32)
    norm = jnp.sqrt(jnp.sum(x32 * x32, axis=-1, keepdims=True))
    return (x32 / jnp.maximum(norm, eps)).astype(x.dtype)


if __name__ == "__main__":
    key = jax.random.PRNGKey(0)
    k1, k2, k3 = jax.random.split(key, 3)

    # Small shape consistent with the module: (batch=2, seq=8, hidden=32), f32.
    x1 = jax.random.normal(k1, (2, 8, 32), dtype=jnp.float32)
    y1 = jax.block_until_ready(normalize_func(x1, mode="unit"))
    assert jnp.allclose(y1, _reference(x1), atol=1e-5, rtol=1e-5), "f32 mismatch"

    # Ragged row count (rows = 15, not a multiple of the tile) exercises the
    # cdiv grid / masked final block path.
    x2 = jax.random.normal(k2, (3, 5, 32), dtype=jnp.float32)
    y2 = jax.block_until_ready(normalize_func(x2, mode="unit"))
    assert jnp.allclose(y2, _reference(x2), atol=1e-5, rtol=1e-5), "ragged mismatch"

    # bf16 path (row multiple of 16, f32 accumulation inside the kernel).
    x3 = jax.random.normal(k3, (4, 40), dtype=jnp.bfloat16)
    y3 = jax.block_until_ready(normalize_func(x3, mode="unit"))
    assert jnp.allclose(
        y3.astype(jnp.float32), _reference(x3).astype(jnp.float32),
        atol=1e-2, rtol=1e-2,
    ), "bf16 mismatch"

    # mode='none' identity path.
    y_none = normalize_func(x1, mode="none")
    assert jnp.array_equal(y_none, x1)

    print("KERNEL_OK")
</pallas_src>

<mosaic_0001>
module attributes {stable_mosaic.version = 11 : i64} {
  func.func @_unit_norm_kernel(%arg0: i32, %arg1: memref<16x32xf32, #tpu.memory_space<vmem>>, %arg2: memref<16x32xf32, #tpu.memory_space<vmem>>) attributes {dimension_semantics = [#tpu.dimension_semantics<parallel>], iteration_bounds = array<i64: 1>, scalar_prefetch = 0 : i64, scratch_operands = 0 : i64, tpu.core_type = #tpu.core_type<tc>, window_params = [{transform_indices = @transform_0, window_bounds = array<i64: 16, 32>}, {transform_indices = @transform_1, window_bounds = array<i64: 16, 32>}]} {
    %c0 = arith.constant 0 : index
    %c0_0 = arith.constant 0 : index
    %0 = vector.load %arg1[%c0, %c0_0] : memref<16x32xf32, #tpu.memory_space<vmem>>, vector<16x32xf32>
    %1 = arith.mulf %0, %0 : vector<16x32xf32>
    %cst = arith.constant dense<0.000000e+00> : vector<16xf32>
    %2 = vector.multi_reduction <add>, %1, %cst [1] : vector<16x32xf32> to vector<16xf32>
    %3 = vector.shape_cast %2 : vector<16xf32> to vector<16x1xf32>
    %4 = math.rsqrt %3 : vector<16x1xf32>
    %cst_1 = arith.constant 1.000000e+08 : f32
    %5 = vector.broadcast %cst_1 : f32 to vector<16x1xf32>
    %6 = arith.minimumf %4, %5 : vector<16x1xf32>
    %7 = vector.broadcast %6 : vector<16x1xf32> to vector<16x32xf32>
    %8 = arith.mulf %0, %7 : vector<16x32xf32>
    %c0_2 = arith.constant 0 : index
    %c0_3 = arith.constant 0 : index
    %9 = vector.load %arg2[%c0_2, %c0_3] : memref<16x32xf32, #tpu.memory_space<vmem>>, vector<16x32xf32>
    tpu.vector_store %arg2[%c0_2, %c0_3], %8 {strides = array<i32>} : memref<16x32xf32, #tpu.memory_space<vmem>>, vector<16x32xf32>,
    return
  }
  func.func @transform_0(%arg0: i32) -> (i32, i32) {
    %c0_i32 = arith.constant 0 : i32
    %c0_i32_0 = arith.constant 0 : i32
    return %arg0, %c0_i32 : i32, i32
  }
  func.func @transform_1(%arg0: i32) -> (i32, i32) {
    %c0_i32 = arith.constant 0 : i32
    %c0_i32_0 = arith.constant 0 : i32
    return %arg0, %c0_i32 : i32, i32
  }
}

</mosaic_0001>

<bundles_post_ra>
// kernel: tpu_custom_call.1
= control target key start
LH: loop header
LB: loop body
LE: loop exit
PB: predicated region body
PF: predicated region fallthrough
CT: control target
= control target key end

     0   :  { %6 = vsyncpa [#allocation3], 0  ;;  %s171_s0 = inlined_call_operand.hbm [shape: f32[16,32], index: 0, kind: input, shape index: {}]   ;;  %s172_s1 = inlined_call_operand.hbm [shape: f32[16,32], index: 1, kind: output, shape index: {}]  }
   0x1   :  { %7 = vsyncpa [#allocation4], 0  ;;  %s12_s8 = sshll.u32 %s171_s0, 4  ;;  %s141_s9 = smov [#allocation2]   ;;  %s13_s8 = int_to_ptr.hbm [resolvable:$true] %s12_s8 }
   0x2   :  { %s14_s10 = sshll.u32 %s141_s9, 4  ;;  %s142_s11 = smov 128   ;;  %s15_s10 = int_to_ptr.vmem [resolvable:$true] %s14_s10 }
   0x3   :  { %s143_s12 = smov 8  }
   0x4   :  { %20 = dma.hbm_to_vmem [thread:$0]  %s13_s8, 256, %s15_s10, [#allocation3], %s142_s11, %s142_s11, %s143_s12  }
   0x5   :  { %137 = dma.done.wait [#allocation3], 256  }
   0x6   :  { %138 = vsyncadd [#allocation3], 4294967040  ;;  %v25_v0 = vld [vmem:[#allocation2] sm:$0xff]  ;;  %vm29_vm0 = vcmask 261120   ;;  %v26_v2 = vld [vmem:[#allocation2 + $0x8] sm:$0xff]  ;;  %s144_s0 = smov [#allocation5]  }
   0x7   :  { %v27_v1 = vmul.f32 %v25_v0, %v25_v0  ;;  %v28_v4 = vmul.f32 %v26_v2, %v26_v2  ;;  %s66_s13 = sshll.u32 %s144_s0, 4  ;;  %s68_s16 = sshll.u32 %s172_s1, 4  ;;  %s67_s13 = int_to_ptr.vmem [resolvable:$true] %s66_s13  ;;  %s69_s16 = int_to_ptr.hbm [resolvable:$true] %s68_s16 }
   0x9   :  { %v30_v3 = vsel %vm29_vm0, %v27_v1, 0.0  ;;  %v33_v5 = vsel %vm29_vm0, %v28_v4, 0.0 }
   0xa   :  { %31 = vadd.xlane.f32.xlu0 %v30_v3 }
  0x12   :  { %34 = vadd.xlane.f32.xlu0 %v33_v5 }
  0x7d   :  { %v32_v6 = vpop.xlane.xlu0 %31 }
  0x7e   :  { %85 = vrsqrt.f32 %v32_v6  ;;  %vm42_vm2 = vweird.f32 %v32_v6 }
  0x84   :  { %v86_v7 = vpop.eup %85 }
  0x85   :  { %v37_v8 = vmul.f32 %v86_v7, %v32_v6  ;;  %v35_v9 = vpop.xlane.xlu0 %34  ;;  %vm43_vm1 = vweird.f32 %v86_v7 }
  0x86   :  { %87 = vrsqrt.f32 %v35_v9  ;;  %vm44_vm3 = vmor %vm42_vm2, %vm43_vm1  ;;  %vm52_vm5 = vweird.f32 %v35_v9 }
  0x87   :  { %v38_v10 = vmul.f32 %v86_v7, %v37_v8 }
  0x89   :  { %v39_v11 = vmul.f32 0.5, %v38_v10 }
  0x8b   :  { %v40_v12 = vsub.f32 1.5, %v39_v11 }
  0x8c   :  { %v88_v13 = vpop.eup %87 }
  0x8d   :  { %v41_v14 = vmul.f32 %v86_v7, %v40_v12  ;;  %v47_v15 = vmul.f32 %v88_v13, %v35_v9  ;;  %vm53_vm4 = vweird.f32 %v88_v13 }
  0x8e   :  { %vm54_vm6 = vmor %vm52_vm5, %vm53_vm4 }
  0x8f   :  { %v45_v16 = vsel %vm44_vm3, %v86_v7, %v41_v14  ;;  %v48_v17 = vmul.f32 %v88_v13, %v47_v15 }
  0x90   :  { %v56_v18 = vmin.f32 %v45_v16, 1e+08 }
  0x91   :  { %v49_v19 = vmul.f32 0.5, %v48_v17 }
  0x92   :  { %v58_v20 = vmul.f32 %v56_v18, %v25_v0 }
  0x93   :  { %v50_v21 = vsub.f32 1.5, %v49_v19 }
  0x94   :  { %60 = vst.msk [vmem:[#allocation5] sm:$0xff] %vm29_vm0, %v58_v20 }
  0x95   :  { %v51_v22 = vmul.f32 %v88_v13, %v50_v21 }
  0x97   :  { %v55_v23 = vsel %vm54_vm6, %v88_v13, %v51_v22 }
  0x98   :  { %v57_v24 = vmin.f32 %v55_v23, 1e+08 }
  0x9a   :  { %v59_v25 = vmul.f32 %v57_v24, %v26_v2 }
  0x9c   :  { %61 = vst.msk [vmem:[#allocation5 + $0x8] sm:$0xff] %vm29_vm0, %v59_v25 }
  0x9d   :  { %74 = dma.vmem_to_hbm [thread:$0]  %s67_s13, 256, %s69_s16, [#allocation4], %s142_s11, %s142_s11, %s143_s12  }
  0x9e   :  { %139 = dma.done.wait [#allocation4], 256  }
  0x9f   :  { %140 = vsyncadd [#allocation4], 4294967040 }
  0xa0   :  { %79 = vsyncpa [#allocation3], 1 }
  0xa1   :  { %80 = vsyncpa [#allocation4], 1 }

</bundles_post_ra>
